<compile_context>
chip_gen: v5e
topology: v5e:2x2
jax: 0.10.0
libtpu: 0.0.40
codegen_flags: <defaults>
</compile_context>

<pallas_src>
import jax
import jax.numpy as jnp
from jax.experimental import pallas as pl
from jax.experimental.pallas import tpu as pltpu


def conv_bn_relu_kernel(x_ref, w_ref, shift_ref, o_ref):
    # x_ref:     (C_in, tl)   -- one batch element, one lane tile of L
    # w_ref:     (C_out, C_in) -- BN-scale already folded in
    # shift_ref: (C_out, 1)    -- fused conv-bias + BN shift
    # o_ref:     (C_out, tl)
    y = jnp.dot(w_ref[...], x_ref[...], preferred_element_type=jnp.float32)
    o_ref[...] = jnp.maximum(y + shift_ref[...], 0.0)   # fused BN shift + ReLU


def conv_bn_relu_1d(x, weight, bias, gamma, beta, running_mean, running_var,
                    eps=1e-5, tl=None):
    """x: (B, C_in, L) float32.  weight: (C_out, C_in) (k=1 conv squeezed).

    Inference-mode BatchNorm (running stats) folded into the conv:
        y = relu( (gamma/std * W) @ x + ((bias - mean) * gamma/std + beta) )
    """
    B, C_in, L = x.shape
    C_out = weight.shape[0]

    # --- fold conv bias + BN into the weight (scale) and a shift vector ------
    inv_std = 1.0 / jnp.sqrt(running_var + eps)
    scale = gamma * inv_std                                     # (C_out,)
    w_scaled = (weight * scale[:, None]).astype(jnp.float32)    # (C_out, C_in)
    shift = ((bias - running_mean) * scale + beta).reshape(C_out, 1)

    # --- pick a lane tile: large (amortizes ~600-cycle/step overhead), multiple
    # of 128 (lane-dense stores), conservative VMEM working set (~8 MiB, fits
    # the default scoped VMEM on v5e/v6e/v7x with double buffering). ----------
    if tl is None:
        budget = 8 * 1024 * 1024
        per_lane_bytes = 4 * 2 * (C_in + C_out)   # dbl-buffered input + output columns
        tl = (budget // per_lane_bytes) // 128 * 128
        tl = int(max(128, min(2048, tl)))
    l_rounded = ((L + 127) // 128) * 128
    tl = min(tl, l_rounded)

    # --- pad L so the grid covers it exactly (no divisibility constraint) ----
    num_l_tiles = pl.cdiv(L, tl)
    L_pad = num_l_tiles * tl
    if L_pad != L:
        x = jnp.pad(x, ((0, 0), (0, 0), (0, L_pad - L)))

    cost = pl.CostEstimate(
        flops=2 * B * L_pad * C_in * C_out,
        transcendentals=0,
        bytes_accessed=4 * (B * C_in * L_pad + C_out * C_in + B * C_out * L_pad),
    )

    out = pl.pallas_call(
        conv_bn_relu_kernel,
        out_shape=jax.ShapeDtypeStruct((B, C_out, L_pad), jnp.float32),
        grid=(B, num_l_tiles),
        in_specs=[
            # batch dim squeezed out of the kernel view; L on lanes
            pl.BlockSpec((None, C_in, tl), lambda b, l: (b, 0, l)),
            pl.BlockSpec((C_out, C_in), lambda b, l: (0, 0)),
            pl.BlockSpec((C_out, 1), lambda b, l: (0, 0)),
        ],
        out_specs=pl.BlockSpec((None, C_out, tl), lambda b, l: (b, 0, l)),
        compiler_params=pltpu.CompilerParams(
            dimension_semantics=("parallel", "parallel")),
        cost_estimate=cost,
    )(x, w_scaled, shift)

    # drop the L padding; output is already (B, C_out, L) -- no transposes.
    return out[:, :, :L]


if __name__ == "__main__":
    B, C_in, C_out, L = 2, 4, 8, 16

    key = jax.random.PRNGKey(0)
    kx, kw, kb, kg, kbt, km, kv = jax.random.split(key, 7)

    x = jax.random.normal(kx, (B, C_in, L), dtype=jnp.float32)

    # Deterministic synthetic parameters (shapes from nn.Conv1d(C_in, C_out, 1)
    # and nn.BatchNorm1d(C_out)).
    weight = jax.random.normal(kw, (C_out, C_in), dtype=jnp.float32) * 0.5
    bias = jax.random.normal(kb, (C_out,), dtype=jnp.float32) * 0.1
    gamma = 1.0 + 0.1 * jax.random.normal(kg, (C_out,), dtype=jnp.float32)
    beta = 0.1 * jax.random.normal(kbt, (C_out,), dtype=jnp.float32)
    running_mean = 0.1 * jax.random.normal(km, (C_out,), dtype=jnp.float32)
    running_var = jnp.abs(1.0 + 0.1 * jax.random.normal(kv, (C_out,),
                                                        dtype=jnp.float32))

    out = conv_bn_relu_1d(x, weight, bias, gamma, beta,
                          running_mean, running_var)
    out = jax.block_until_ready(out)

    # Pure-JAX reference (Conv1d k=1 -> BN inference -> ReLU).
    conv = jnp.einsum('oi,bil->bol', weight, x) + bias[None, :, None]
    inv_std = 1.0 / jnp.sqrt(running_var + 1e-5)
    bn = (conv - running_mean[None, :, None]) * (gamma * inv_std)[None, :, None] \
         + beta[None, :, None]
    ref = jnp.maximum(bn, 0.0)

    # TODO(synk): training-mode BatchNorm (batch statistics + running-stat
    # updates) is not implemented; this kernel matches eval()/inference mode.
    assert out.shape == (B, C_out, L)
    assert jnp.allclose(out, ref, atol=1e-5, rtol=1e-5)
    print("KERNEL_OK")
</pallas_src>

<mosaic_0001>
module attributes {stable_mosaic.version = 11 : i64} {
  func.func @conv_bn_relu_kernel(%arg0: i32, %arg1: i32, %arg2: memref<1x4x128xf32, #tpu.memory_space<vmem>>, %arg3: memref<8x4xf32, #tpu.memory_space<vmem>>, %arg4: memref<8x1xf32, #tpu.memory_space<vmem>>, %arg5: memref<1x8x128xf32, #tpu.memory_space<vmem>>) attributes {dimension_semantics = [#tpu.dimension_semantics<parallel>, #tpu.dimension_semantics<parallel>], iteration_bounds = array<i64: 2, 1>, scalar_prefetch = 0 : i64, scratch_operands = 0 : i64, tpu.core_type = #tpu.core_type<tc>, window_params = [{transform_indices = @transform_0, window_bounds = array<i64: 1, 4, 128>}, {pipeline_mode = #tpu.pipeline_mode<synchronous>, transform_indices = @transform_1, window_bounds = array<i64: 8, 4>}, {pipeline_mode = #tpu.pipeline_mode<synchronous>, transform_indices = @transform_2, window_bounds = array<i64: 8, 1>}, {transform_indices = @transform_3, window_bounds = array<i64: 1, 8, 128>}]} {
    %c0 = arith.constant 0 : index
    %c0_0 = arith.constant 0 : index
    %0 = vector.load %arg3[%c0, %c0_0] : memref<8x4xf32, #tpu.memory_space<vmem>>, vector<8x4xf32>
    %c0_1 = arith.constant 0 : index
    %c0_2 = arith.constant 0 : index
    %c0_3 = arith.constant 0 : index
    %1 = vector.load %arg2[%c0_1, %c0_2, %c0_3] : memref<1x4x128xf32, #tpu.memory_space<vmem>>, vector<1x4x128xf32>
    %2 = vector.shape_cast %1 : vector<1x4x128xf32> to vector<4x128xf32>
    %cst = arith.constant dense<0.000000e+00> : vector<8x128xf32>
    %3 = tpu.matmul %0, %2, %cst {dimension_numbers = #tpu.dot_dimension_numbers<[1], [0], [0], [1], [0, 0, 1, 1], [], []>} : vector<8x4xf32>, vector<4x128xf32>, vector<8x128xf32> -> vector<8x128xf32>
    %c0_4 = arith.constant 0 : index
    %c0_5 = arith.constant 0 : index
    %4 = vector.load %arg4[%c0_4, %c0_5] : memref<8x1xf32, #tpu.memory_space<vmem>>, vector<8x1xf32>
    %5 = vector.broadcast %4 : vector<8x1xf32> to vector<8x128xf32>
    %6 = arith.addf %3, %5 : vector<8x128xf32>
    %cst_6 = arith.constant 0.000000e+00 : f32
    %7 = vector.broadcast %cst_6 : f32 to vector<8x128xf32>
    %8 = arith.maximumf %6, %7 : vector<8x128xf32>
    %c0_7 = arith.constant 0 : index
    %c0_8 = arith.constant 0 : index
    %c0_9 = arith.constant 0 : index
    %9 = vector.load %arg5[%c0_7, %c0_8, %c0_9] : memref<1x8x128xf32, #tpu.memory_space<vmem>>, vector<1x8x128xf32>
    %10 = vector.shape_cast %9 : vector<1x8x128xf32> to vector<8x128xf32>
    %11 = vector.shape_cast %8 : vector<8x128xf32> to vector<1x8x128xf32>
    tpu.vector_store %arg5[%c0_7, %c0_8, %c0_9], %11 {strides = array<i32>} : memref<1x8x128xf32, #tpu.memory_space<vmem>>, vector<1x8x128xf32>,
    return
  }
  func.func @transform_0(%arg0: i32, %arg1: i32) -> (i32, i32, i32) {
    %c0_i32 = arith.constant 0 : i32
    %c0_i32_0 = arith.constant 0 : i32
    return %arg0, %c0_i32, %arg1 : i32, i32, i32
  }
  func.func @transform_1(%arg0: i32, %arg1: i32) -> (i32, i32) {
    %c0_i32 = arith.constant 0 : i32
    %c0_i32_0 = arith.constant 0 : i32
    %c0_i32_1 = arith.constant 0 : i32
    return %c0_i32, %c0_i32_0 : i32, i32
  }
  func.func @transform_2(%arg0: i32, %arg1: i32) -> (i32, i32) {
    %c0_i32 = arith.constant 0 : i32
    %c0_i32_0 = arith.constant 0 : i32
    %c0_i32_1 = arith.constant 0 : i32
    return %c0_i32, %c0_i32_0 : i32, i32
  }
  func.func @transform_3(%arg0: i32, %arg1: i32) -> (i32, i32, i32) {
    %c0_i32 = arith.constant 0 : i32
    %c0_i32_0 = arith.constant 0 : i32
    return %arg0, %c0_i32, %arg1 : i32, i32, i32
  }
}

</mosaic_0001>

<bundles_post_ra>
// kernel: tpu_custom_call.1
= control target key start
LH: loop header
LB: loop body
LE: loop exit
PB: predicated region body
PF: predicated region fallthrough
CT: control target
= control target key end

     0   :  { %8 = vsyncpa [#allocation3], 0  ;;  %s591_s0 = inlined_call_operand.vmem [shape: f32[2,4,128], index: 0, kind: input, shape index: {}]   ;;  %s592_s1 = inlined_call_operand.vmem [shape: f32[8,4], index: 1, kind: input, shape index: {}]   ;;  %s593_s2 = inlined_call_operand.vmem [shape: f32[8,1], index: 2, kind: input, shape index: {}]   ;;  %s594_s3 = inlined_call_operand.hbm [shape: f32[2,8,128], index: 3, kind: output, shape index: {}]  }
   0x1   :  { %10 = vsyncpa [#allocation3 + $0x1], 0  ;;  %s488_s12 = smov 0   ;;  %s490_s13 = smov 0  }
   0x2   :  { %s492_s14 = smov 0   ;;  %s494_s15 = smov 0  }
   0x3   :  { %s496_s16 = smov 0   ;;  %s498_s17 = smov 0  }
   0x4 LB: > { %s317_s18 = sadd.s32 4294967295, %s465_s17   ;;  %s318_s19 = sadd.s32 4294967294, %s465_s17   ;;  %s465_s17 = sphi %s498_s17, %s16_s17   ;;  %s461_s16 = sphi %s496_s16, %s601_s16   ;;  %s457_s15 = sphi %s494_s15, %s600_s15   ;;  %s453_s14 = sphi %s492_s14, %s599_s14   ;;  %s449_s13 = sphi %s490_s13, %s598_s13   ;;  %s445_s12 = sphi %s488_s12, %s597_s12  }
   0x5   : > { %s28_s20 = sadd.s32 1, %s461_s16  ;;  %s107_s21 = sadd.s32 1, %s453_s14 }
   0x6   : > { %p30_p0 = scmp.ge.s32.totalorder %s28_s20, 2  ;;  %p117_p1 = scmp.ne.s32.totalorder %s453_s14, %s449_s13 }
   0x7   : > { %p118_p2 = scmp.eq.s32.totalorder %s317_s18, 1  ;;  %p123_p3 = scmp.ne.s32.totalorder %s449_s13, %s445_s12 }
   0x8   : > { %s603_s20 = smov (%p30_p0, %s28_s20), 0  ;;  %p124_p5 = scmp.eq.s32.totalorder %s318_s19, 1 }
   0x9   : > { %p528_p4 = por %p118_p2, %p117_p1  ;;  %s102_s23 = ssub.s32 %s461_s16, %s603_s20 }
   0xa   : > { %p321_p6 = scmp.ge.s32.totalorder %s465_s17, 1  ;;  %p105_p7 = scmp.eq.s32.totalorder %s102_s23, 0 }
   0xb   : > { %p535_p8 = por %p124_p5, %p123_p3  ;;  %p158_p9 = scmp.lt.s32.totalorder %s465_s17, 3 }
   0xc   : > { %s541_s25 = scalar_select %p105_p7, %s453_s14, %s107_s21  }
   0xd   : > { %p159_p10 = pnand %p321_p6, %p158_p9 }
   0xe   : > { %p184_p11 = scmp.lt.s32.totalorder (!%p159_p10), %s457_s15, 1  ;;  %s181_s8 = sand.u32 (!%p159_p10), 1, %s449_s13  }
   0xf   : > { %162 = sbr.rel (%p159_p10) target bundleno = 159 (0x9f), region = 32  ;;  %s322_s9 = sshll.u32 (!%p159_p10), %s181_s8, 3 }
  0x10   : > { %s327_s10 = sshll.u32 (!%p159_p10), %s457_s15, 3  ;;  %s183_s21 = scalar_lea.vmem (!%p159_p10), [#allocation2], %s322_s9 }
  0x11   : > { %s241_s19 = scalar_lea.hbm (!%p159_p10), %s594_s3, %s327_s10  ;;  %s243_s23 = sshll.u32 (!%p159_p10), %s183_s21, 4  ;;  %s244_s23 = int_to_ptr.vmem [resolvable:$true] %s243_s23 }
  0x12   : > { %s245_s26 = sshll.u32 (!%p159_p10), %s241_s19, 4  ;;  %s230_s27 = scalar_lea.sflag (!%p159_p10), [#allocation3], %s181_s8  ;;  %s246_s26 = int_to_ptr.hbm [resolvable:$true] %s245_s26 }
  0x13   : > { %s407_s4 = scalar_lea.hbm (!%p159_p10), %s594_s3, 16 }
  0x14   : > { %v193_v0 = vld [vmem:[%s593_s2] sm:$0xff]  ;;  %v467_v1 = vmov 0   ;;  %s185_s28 = scalar_select %p184_p11, %s457_s15, 1  ;;  %vm203_vm0 = vcmask 1043456   ;;  %vm199_vm1 = vcmask 31744  }
  0x15   : > { %386 = vset.pattern.permute.xlu0 %v467_v1  ;;  %v191_v2 = vld [vmem:[%s592_s1] sm:$0xff] }
  0x16   : > { %196 = vperm.xlu0 %386, %v193_v0   ;;  %s323_s29 = sshll.u32 %s185_s28, 2  ;;  %s401_s28 = sshra.s32 %s246_s26, 4  ;;  %s402_s28 = int_to_ptr.hbm [resolvable:$true] %s401_s28 }
  0x17   : > { %s190_s5 = scalar_lea.vmem %s591_s0, %s323_s29  ;;  %s403_s29 = scalar_lea.hbm %s402_s28, 8 }
  0x18   : > { %v192_v3 = vld [vmem:[%s190_s5] sm:$0xf]  ;;  %p404_p12 = scmp.ne.s32.totalorder %s402_s28, %s403_s29  ;;  %p408_p1 = scmp.lt.s32.totalorder %s402_s28, %s594_s3 }
  0x19   : > { %324 = vmatpush.msk.msra.mxu0 %vm203_vm0, %v192_v3  ;;  %p409_p2 = scmp.lt.s32.totalorder %s407_s4, %s403_s29 }
  0x1a   : > { %325 = vmatmul.msk.f32.vlgmr.msra.gmra.mxu0 %vm199_vm1, %v191_v2  ;;  %p405_p13 = pnand %p404_p12, %p528_p4 }
  0x1b   : > { %p410_p3 = por %p409_p2, %p408_p1 }
  0x1c   : > { %p406_p0 = pneg %p405_p13 }
  0x1e   : > { %p411_p5 = pnand %p410_p3, %p406_p0 }
  0x88   : > { %v197_v4 = vpop.permute.xlu0 %196 }
  0x97   : > { %v224_v5 = vpop.f32.mrf.mxu0 }
  0x98   : > { %v225_v6 = vadd.f32 %v224_v5, %v197_v4 }
  0x9a   : > { %v227_v7 = vmax.f32 %v225_v6, 0.0 }
  0x9c   : > { %228 = vst [vmem:[%s183_s21] sm:$0xff] %v227_v7 }
  0x9d   : > { %414 = shalt.err (!%p411_p5)
}
  0x9e   : > { %330 = dma.vmem_to_hbm [thread:$0]  (%p528_p4), %s244_s23, 128, %s246_s26, %s230_s27  }
  0x9f PF: > { %p336_p6 = scmp.ge.s32.totalorder %s465_s17, 2  ;;  %s257_s7 = sand.u32 1, %s445_s12  }
  0xa0   : > { %s258_s8 = scalar_lea.sflag [#allocation3], %s257_s7 }
  0xa1   : > { %p333_p7 = pnand %p336_p6, %p535_p8 }
  0xa3   : > { %p334_p9 = pneg %p333_p7 }
  0xa5   : > { %440 = dma.done.wait (%p334_p9), %s258_s8, 128  }
  0xa6   : > { %442 = vsyncadd (%p334_p9), %s258_s8, 4294967168  ;;  %s16_s17 = sadd.s32 1, %s465_s17   ;;  %s597_s12 = smov %s449_s13 }
  0xa7   : > { %p13_p10 = scmp.ge.s32.totalorder %s16_s17, 4   ;;  %s598_s13 = smov %s453_s14 }
  0xa8   : > { %s599_s14 = smov %s541_s25  ;;  %s600_s15 = smov %s461_s16 }
  0xa9   : > { %s601_s16 = smov %s603_s20  ;;  %15 = sbr.rel (!%p13_p10) target bundleno = 4 (0x4), region = 67 }
  0xae   :  { %264 = vsyncpa [#allocation3], 1 }
  0xaf   :  { %266 = vsyncpa [#allocation3 + $0x1], 1 }

</bundles_post_ra>
